<compile_context>
chip_gen: v6e
topology: v6e:2x2x1
jax: 0.10.0
libtpu: 0.0.40
codegen_flags: <defaults>
</compile_context>

<pallas_src>
import functools

import jax
import jax.numpy as jnp
from jax import lax
from jax.experimental import pallas as pl
from jax.experimental.pallas import tpu as pltpu


def policy_kernel(*refs, train):
    if train:
        x_ref, mask_ref, w1_ref, b1_ref, w2t_ref, b2_ref, out_ref = refs
    else:
        x_ref, w1_ref, b1_ref, w2t_ref, b2_ref, out_ref = refs

    x = x_ref[...]            # (TB, 4)
    w1 = w1_ref[...]          # (4, 128)

    # affine1 on the VPU: h = b1 + sum_k x[:, k] * w1[k, :]   (K = 4, unrolled)
    h = b1_ref[...] + (x[:, 0:1] * w1[0:1, :]
                       + x[:, 1:2] * w1[1:2, :]
                       + x[:, 2:3] * w1[2:3, :]
                       + x[:, 3:4] * w1[3:4, :])

    if train:
        # Inverted dropout, p=0.5: mask values are 0.0 or 2.0 (pre-scaled).
        h = h * mask_ref[...]

    h = jnp.maximum(h, 0.0)

    # affine2 on the MXU with lane-dense (2, 128) weights: contract dim 1 of both.
    s = lax.dot_general(
        h, w2t_ref[...],
        dimension_numbers=(((1,), (1,)), ((), ())),
        preferred_element_type=jnp.float32,
    ) + b2_ref[...]           # (TB, 2)

    # softmax over 2 classes == sigmoid of the logit difference (exact identity).
    d = s[:, 1:2] - s[:, 0:1]               # (TB, 1)
    p1 = 1.0 / (1.0 + jnp.exp(-d))
    out_ref[...] = jnp.concatenate([1.0 - p1, p1], axis=-1)


def policy_forward(x, w1, b1, w2t, b2, *, dropout_mask=None):
    """Pallas forward. dropout_mask=None -> eval mode (dropout = identity)."""
    B = x.shape[0]
    TB = B if B <= 1024 else 1024           # single block for small B; 8-aligned tile otherwise
    grid = (pl.cdiv(B, TB),)
    train = dropout_mask is not None
    kernel = functools.partial(policy_kernel, train=train)

    in_specs = [pl.BlockSpec((TB, 4), lambda i: (i, 0))]
    args = [x]
    if train:
        in_specs.append(pl.BlockSpec((TB, 128), lambda i: (i, 0)))
        args.append(dropout_mask)
    in_specs += [
        pl.BlockSpec((4, 128), lambda i: (0, 0)),   # W1 (resident)
        pl.BlockSpec((1, 128), lambda i: (0, 0)),   # b1
        pl.BlockSpec((2, 128), lambda i: (0, 0)),   # W2^T (lane-dense)
        pl.BlockSpec((1, 2), lambda i: (0, 0)),     # b2
    ]
    args += [w1, b1, w2t, b2]

    return pl.pallas_call(
        kernel,
        out_shape=jax.ShapeDtypeStruct((B, 2), jnp.float32),
        grid=grid,
        in_specs=in_specs,
        out_specs=pl.BlockSpec((TB, 2), lambda i: (i, 0)),
        compiler_params=pltpu.CompilerParams(dimension_semantics=("parallel",)),
    )(*args)


def init_policy_params(key):
    """Deterministic init mimicking nn.Linear defaults (U(-1/sqrt(fan_in), +)).

    W2 is stored transposed (2, 128) so the kernel keeps it lane-dense.
    """
    k1, k2, k3, k4 = jax.random.split(key, 4)
    bound1 = 1.0 / jnp.sqrt(4.0)
    bound2 = 1.0 / jnp.sqrt(128.0)
    w1 = jax.random.uniform(k1, (4, 128), jnp.float32, -bound1, bound1)
    b1 = jax.random.uniform(k2, (1, 128), jnp.float32, -bound1, bound1)
    w2t = jax.random.uniform(k3, (2, 128), jnp.float32, -bound2, bound2)
    b2 = jax.random.uniform(k4, (1, 2), jnp.float32, -bound2, bound2)
    return w1, b1, w2t, b2


def policy_forward_ref(x, w1, b1, w2t, b2, dropout_mask=None):
    """Pure-JAX reference."""
    h = x @ w1 + b1
    if dropout_mask is not None:
        h = h * dropout_mask
    h = jnp.maximum(h, 0.0)
    s = h @ w2t.T + b2
    return jax.nn.softmax(s, axis=1)


if __name__ == "__main__":
    key = jax.random.PRNGKey(0)
    kp, kx, kd = jax.random.split(key, 3)
    w1, b1, w2t, b2 = init_policy_params(kp)

    B = 8  # small batch of 4-dim CartPole-like observations
    x = jax.random.normal(kx, (B, 4), dtype=jnp.float32)

    # Eval-mode forward (deterministic, matches PyTorch module.eval()).
    out = policy_forward(x, w1, b1, w2t, b2)
    out = jax.block_until_ready(out)

    ref = policy_forward_ref(x, w1, b1, w2t, b2)
    assert out.shape == (B, 2)
    assert jnp.allclose(out, ref, atol=1e-5, rtol=1e-5)
    assert jnp.allclose(jnp.sum(out, axis=1), 1.0, atol=1e-5)

    # Training-mode forward: host-generated inverted-dropout mask (p=0.5, x2 scale),
    # matching torch Dropout training semantics (vary the key per step in a real loop).
    keep = jax.random.bernoulli(kd, 0.5, (B, 128))
    mask = keep.astype(jnp.float32) * 2.0
    out_train = policy_forward(x, w1, b1, w2t, b2, dropout_mask=mask)
    out_train = jax.block_until_ready(out_train)

    ref_train = policy_forward_ref(x, w1, b1, w2t, b2, dropout_mask=mask)
    assert out_train.shape == (B, 2)
    assert jnp.allclose(out_train, ref_train, atol=1e-5, rtol=1e-5)
    assert jnp.allclose(jnp.sum(out_train, axis=1), 1.0, atol=1e-5)

    print("KERNEL_OK")
</pallas_src>

<mosaic_0001>
module attributes {stable_mosaic.version = 11 : i64} {
  func.func @policy_kernel(%arg0: i32, %arg1: memref<8x4xf32, #tpu.memory_space<vmem>>, %arg2: memref<4x128xf32, #tpu.memory_space<vmem>>, %arg3: memref<1x128xf32, #tpu.memory_space<vmem>>, %arg4: memref<2x128xf32, #tpu.memory_space<vmem>>, %arg5: memref<1x2xf32, #tpu.memory_space<vmem>>, %arg6: memref<8x2xf32, #tpu.memory_space<vmem>>) attributes {dimension_semantics = [#tpu.dimension_semantics<parallel>], iteration_bounds = array<i64: 1>, scalar_prefetch = 0 : i64, scratch_operands = 0 : i64, tpu.core_type = #tpu.core_type<tc>, window_params = [{transform_indices = @transform_0, window_bounds = array<i64: 8, 4>}, {pipeline_mode = #tpu.pipeline_mode<synchronous>, transform_indices = @transform_1, window_bounds = array<i64: 4, 128>}, {pipeline_mode = #tpu.pipeline_mode<synchronous>, transform_indices = @transform_2, window_bounds = array<i64: 1, 128>}, {pipeline_mode = #tpu.pipeline_mode<synchronous>, transform_indices = @transform_3, window_bounds = array<i64: 2, 128>}, {pipeline_mode = #tpu.pipeline_mode<synchronous>, transform_indices = @transform_4, window_bounds = array<i64: 1, 2>}, {transform_indices = @transform_5, window_bounds = array<i64: 8, 2>}]} {
    %c0 = arith.constant 0 : index
    %c0_0 = arith.constant 0 : index
    %0 = vector.load %arg1[%c0, %c0_0] : memref<8x4xf32, #tpu.memory_space<vmem>>, vector<8x4xf32>
    %c0_1 = arith.constant 0 : index
    %c0_2 = arith.constant 0 : index
    %1 = vector.load %arg2[%c0_1, %c0_2] : memref<4x128xf32, #tpu.memory_space<vmem>>, vector<4x128xf32>
    %c0_3 = arith.constant 0 : index
    %c0_4 = arith.constant 0 : index
    %2 = vector.load %arg3[%c0_3, %c0_4] : memref<1x128xf32, #tpu.memory_space<vmem>>, vector<1x128xf32>
    %3 = vector.extract_strided_slice %0 {offsets = [0, 0], sizes = [8, 1], strides = [1, 1]} : vector<8x4xf32> to vector<8x1xf32>
    %4 = vector.extract_strided_slice %1 {offsets = [0, 0], sizes = [1, 128], strides = [1, 1]} : vector<4x128xf32> to vector<1x128xf32>
    %5 = vector.broadcast %3 : vector<8x1xf32> to vector<8x128xf32>
    %6 = vector.broadcast %4 : vector<1x128xf32> to vector<8x128xf32>
    %7 = arith.mulf %5, %6 : vector<8x128xf32>
    %8 = vector.extract_strided_slice %0 {offsets = [0, 1], sizes = [8, 1], strides = [1, 1]} : vector<8x4xf32> to vector<8x1xf32>
    %9 = vector.extract_strided_slice %1 {offsets = [1, 0], sizes = [1, 128], strides = [1, 1]} : vector<4x128xf32> to vector<1x128xf32>
    %10 = vector.broadcast %8 : vector<8x1xf32> to vector<8x128xf32>
    %11 = vector.broadcast %9 : vector<1x128xf32> to vector<8x128xf32>
    %12 = arith.mulf %10, %11 : vector<8x128xf32>
    %13 = arith.addf %7, %12 : vector<8x128xf32>
    %14 = vector.extract_strided_slice %0 {offsets = [0, 2], sizes = [8, 1], strides = [1, 1]} : vector<8x4xf32> to vector<8x1xf32>
    %15 = vector.extract_strided_slice %1 {offsets = [2, 0], sizes = [1, 128], strides = [1, 1]} : vector<4x128xf32> to vector<1x128xf32>
    %16 = vector.broadcast %14 : vector<8x1xf32> to vector<8x128xf32>
    %17 = vector.broadcast %15 : vector<1x128xf32> to vector<8x128xf32>
    %18 = arith.mulf %16, %17 : vector<8x128xf32>
    %19 = arith.addf %13, %18 : vector<8x128xf32>
    %20 = vector.extract_strided_slice %0 {offsets = [0, 3], sizes = [8, 1], strides = [1, 1]} : vector<8x4xf32> to vector<8x1xf32>
    %21 = vector.extract_strided_slice %1 {offsets = [3, 0], sizes = [1, 128], strides = [1, 1]} : vector<4x128xf32> to vector<1x128xf32>
    %22 = vector.broadcast %20 : vector<8x1xf32> to vector<8x128xf32>
    %23 = vector.broadcast %21 : vector<1x128xf32> to vector<8x128xf32>
    %24 = arith.mulf %22, %23 : vector<8x128xf32>
    %25 = arith.addf %19, %24 : vector<8x128xf32>
    %26 = vector.broadcast %2 : vector<1x128xf32> to vector<8x128xf32>
    %27 = arith.addf %26, %25 : vector<8x128xf32>
    %cst = arith.constant 0.000000e+00 : f32
    %28 = vector.broadcast %cst : f32 to vector<8x128xf32>
    %29 = arith.maximumf %27, %28 : vector<8x128xf32>
    %c0_5 = arith.constant 0 : index
    %c0_6 = arith.constant 0 : index
    %30 = vector.load %arg4[%c0_5, %c0_6] : memref<2x128xf32, #tpu.memory_space<vmem>>, vector<2x128xf32>
    %cst_7 = arith.constant dense<0.000000e+00> : vector<8x2xf32>
    %31 = tpu.matmul %29, %30, %cst_7 {dimension_numbers = #tpu.dot_dimension_numbers<[1], [1], [0], [0], [0, 0, 1, 0], [], []>} : vector<8x128xf32>, vector<2x128xf32>, vector<8x2xf32> -> vector<8x2xf32>
    %c0_8 = arith.constant 0 : index
    %c0_9 = arith.constant 0 : index
    %32 = vector.load %arg5[%c0_8, %c0_9] : memref<1x2xf32, #tpu.memory_space<vmem>>, vector<1x2xf32>
    %33 = vector.broadcast %32 : vector<1x2xf32> to vector<8x2xf32>
    %34 = arith.addf %31, %33 : vector<8x2xf32>
    %35 = vector.extract_strided_slice %34 {offsets = [0, 1], sizes = [8, 1], strides = [1, 1]} : vector<8x2xf32> to vector<8x1xf32>
    %36 = vector.extract_strided_slice %34 {offsets = [0, 0], sizes = [8, 1], strides = [1, 1]} : vector<8x2xf32> to vector<8x1xf32>
    %37 = arith.subf %35, %36 : vector<8x1xf32>
    %cst_10 = arith.constant 0.000000e+00 : f32
    %38 = vector.broadcast %cst_10 : f32 to vector<8x1xf32>
    %39 = arith.subf %38, %37 : vector<8x1xf32>
    %40 = math.exp %39 : vector<8x1xf32>
    %cst_11 = arith.constant 1.000000e+00 : f32
    %41 = vector.broadcast %cst_11 : f32 to vector<8x1xf32>
    %42 = arith.addf %41, %40 : vector<8x1xf32>
    %cst_12 = arith.constant 1.000000e+00 : f32
    %43 = vector.broadcast %cst_12 : f32 to vector<8x1xf32>
    %44 = arith.divf %43, %42 : vector<8x1xf32>
    %cst_13 = arith.constant 1.000000e+00 : f32
    %45 = vector.broadcast %cst_13 : f32 to vector<8x1xf32>
    %46 = arith.subf %45, %44 : vector<8x1xf32>
    %47 = tpu.concatenate %46, %44 in 1 : vector<8x1xf32>, vector<8x1xf32> -> vector<8x2xf32>
    %c0_14 = arith.constant 0 : index
    %c0_15 = arith.constant 0 : index
    %48 = vector.load %arg6[%c0_14, %c0_15] : memref<8x2xf32, #tpu.memory_space<vmem>>, vector<8x2xf32>
    tpu.vector_store %arg6[%c0_14, %c0_15], %47 {strides = array<i32>} : memref<8x2xf32, #tpu.memory_space<vmem>>, vector<8x2xf32>,
    return
  }
  func.func @transform_0(%arg0: i32) -> (i32, i32) {
    %c0_i32 = arith.constant 0 : i32
    %c0_i32_0 = arith.constant 0 : i32
    return %arg0, %c0_i32 : i32, i32
  }
  func.func @transform_1(%arg0: i32) -> (i32, i32) {
    %c0_i32 = arith.constant 0 : i32
    %c0_i32_0 = arith.constant 0 : i32
    %c0_i32_1 = arith.constant 0 : i32
    return %c0_i32, %c0_i32_0 : i32, i32
  }
  func.func @transform_2(%arg0: i32) -> (i32, i32) {
    %c0_i32 = arith.constant 0 : i32
    %c0_i32_0 = arith.constant 0 : i32
    %c0_i32_1 = arith.constant 0 : i32
    return %c0_i32, %c0_i32_0 : i32, i32
  }
  func.func @transform_3(%arg0: i32) -> (i32, i32) {
    %c0_i32 = arith.constant 0 : i32
    %c0_i32_0 = arith.constant 0 : i32
    %c0_i32_1 = arith.constant 0 : i32
    return %c0_i32, %c0_i32_0 : i32, i32
  }
  func.func @transform_4(%arg0: i32) -> (i32, i32) {
    %c0_i32 = arith.constant 0 : i32
    %c0_i32_0 = arith.constant 0 : i32
    %c0_i32_1 = arith.constant 0 : i32
    return %c0_i32, %c0_i32_0 : i32, i32
  }
  func.func @transform_5(%arg0: i32) -> (i32, i32) {
    %c0_i32 = arith.constant 0 : i32
    %c0_i32_0 = arith.constant 0 : i32
    return %arg0, %c0_i32 : i32, i32
  }
}

</mosaic_0001>

<bundles_post_ra>
// kernel: tpu_custom_call.1
= control target key start
LH: loop header
LB: loop body
LE: loop exit
PB: predicated region body
PF: predicated region fallthrough
CT: control target
= control target key end

     0   :  { %v199_v0 = vmov 0   ;;  %v200_v2 = vmov 2   ;;  %v201_v3 = vmov 1   ;;  %v202_v4 = vmov 3   ;;  %s205_s25 = smov 1   ;;  %s255_s0 = inlined_call_operand.vmem [shape: f32[8,4], index: 0, kind: input, shape index: {}]   ;;  %s256_s3 = inlined_call_operand.vmem [shape: f32[2,128], index: 3, kind: input, shape index: {}]   ;;  %s257_s1 = inlined_call_operand.vmem [shape: f32[4,128], index: 1, kind: input, shape index: {}]   ;;  %s258_s2 = inlined_call_operand.vmem [shape: f32[1,128], index: 2, kind: input, shape index: {}]   ;;  %s259_s4 = inlined_call_operand.vmem [shape: f32[1,2], index: 4, kind: input, shape index: {}]   ;;  %s260_s5 = inlined_call_operand.vmem [shape: f32[8,2], index: 5, kind: output, shape index: {}]  }
   0x1   :  { %190 = vset.pattern.permute.xlu0 %v199_v0  ;;  %v20_v1 = vld [vmem:[%s255_s0] sm:$0xff]  ;;  %192 = vset.pattern.permute.xlu1 %v200_v2  ;;  %v203_v5 = vmov 0.0   ;;  %vm204_vm0 = vmmov 0   ;;  %v28_v7 = vlaneseq  ;;  %vm165_vm1 = vcmask 7168  }
   0x2   :  { %25 = vperm.xlu0 %190, %v20_v1   ;;  %44 = vperm.xlu1 %192, %v20_v1   ;;  %v71_v6 = vld [vmem:[%s256_s3] sm:$0x3]  ;;  %vm167_vm2 = vcmask 15360  }
   0x3   :  { %177 = vmatprep.subr.mxu0 %v203_v5  ;;  %179 = vmatprep.mubr.msk.f32.mxu0 %vm204_vm0, %v203_v5  ;;  %v29_v8 = vshrl.u32 %v28_v7, 7  ;;  %v21_v11 = vld [vmem:[%s257_s1] sm:$0xf] }
   0x4   :  { %178 = vmatpush3.xpose.msra.mxu0 %v71_v6  ;;  %v173_v28 = vld [vmem:[%s258_s2] ss:$0 sm:$0xff]  ;;  %s206_s2 = smov 127  }
   0x5   :  { %v30_v9 = vsub.s32 0, %v29_v8  ;;  %v39_v10 = vsub.s32 1, %v29_v8  ;;  %v49_v13 = vsub.s32 2, %v29_v8  ;;  %v59_v15 = vsub.s32 3, %v29_v8  ;;  %v174_v32 = vld [vmem:[%s259_s4] ss:$0 sm:$0xff] }
   0x6   :  { %191 = vset.pattern.permute.xlu0 %v201_v3  ;;  %193 = vset.pattern.permute.xlu1 %v202_v4 }
   0x7   :  { %34 = vperm.xlu0 %191, %v20_v1   ;;  %54 = vperm.xlu1 %193, %v20_v1   ;;  %v31_v16 = vrot.slane %v21_v11, %v30_v9  ;;  %v40_v17 = vrot.slane %v21_v11, %v39_v10  ;;  %v50_v18 = vrot.slane %v21_v11, %v49_v13 }
   0x8   :  { %v60_v19 = vrot.slane %v21_v11, %v59_v15 }
   0xb   :  { %194 = vset.pattern.permute.xlu0 %v202_v4 }
  0x7d   :  { %v26_v12 = vpop.permute.xlu0 %25  ;;  %v45_v14 = vpop.permute.xlu1 %44 }
  0x7e   :  { %v32_v22 = vmul.f32 %v31_v16, %v26_v12  ;;  %v51_v24 = vmul.f32 %v50_v18, %v45_v14 }
  0x82   :  { %v35_v20 = vpop.permute.xlu0 %34  ;;  %v55_v21 = vpop.permute.xlu1 %54 }
  0x83   :  { %v41_v23 = vmul.f32 %v40_v17, %v35_v20  ;;  %v61_v26 = vmul.f32 %v60_v19, %v55_v21 }
  0x85   :  { %v42_v25 = vadd.f32 %v41_v23, %v32_v22 }
  0x87   :  { %v52_v27 = vadd.f32 %v51_v24, %v42_v25 }
  0x89   :  { %v62_v29 = vadd.f32 %v61_v26, %v52_v27 }
  0x8b   :  { %v69_v30 = vadd.f32 %v173_v28, %v62_v29 }
  0x8d   :  { %v70_v31 = vmax.f32 %v69_v30, 0.0 }
  0x8f   :  { %180 = vmatmul.mubr.f32.vlgmr.msra.gmra.mxu0 %v70_v31 }
 0x14f   :  { %v145_v33 = vpop.f32.mrf.mxu0 }
 0x150   :  { %v146_v34 = vadd.f32 %v174_v32, %v145_v33 }
 0x151   :  { %v181_v35 = vpop.f32.mrf.mxu0 }
 0x152   :  { %150 = vrot.lane.b32.xlu1 %v146_v34, %s205_s25 }
 0x1c4   :  { %v151_v36 = vpop.permute.xlu1 %150 }
 0x1c5   :  { %v153_v37 = vsub.f32 %v146_v34, %v151_v36 }
 0x1c7   :  { %v154_v38 = vsub.f32 0.0, %v153_v37 }
 0x1c9   :  { %v155_v39 = vmul.f32 1.442695, %v154_v38 }
 0x1cb   :  { %195 = vpow2.f32 %v155_v39 }
 0x1d8   :  { %v196_v40 = vpop.eup %195 }
 0x1d9   :  { %v157_v41 = vadd.f32 1.0, %v196_v40 }
 0x1db   :  { %197 = vrcp.f32 %v157_v41 }
 0x1e8   :  { %v198_v42 = vpop.eup %197 }
 0x1e9   :  { %v160_v43 = vsub.f32 1.0, %v198_v42 }
 0x1eb   :  { %162 = vrot.lane.b32.xlu0 %v160_v43, %s206_s2 }
 0x25d   :  { %v163_v44 = vpop.permute.xlu0 %162 }
 0x25e   :  { %v166_v45 = vsel %vm165_vm1, %v163_v44, %v198_v42 }
 0x25f   :  { %168 = vst.msk [vmem:[%s260_s5] sm:$0xff] %vm167_vm2, %v166_v45 }

</bundles_post_ra>
